<compile_context>
chip_gen: v7x
topology: tpu7x:2x2x1
jax: 0.10.0
libtpu: 0.0.40
codegen_flags: <defaults>
</compile_context>

<pallas_src>
import functools

import jax
import jax.numpy as jnp
from jax import lax
from jax.experimental import pallas as pl
from jax.experimental.pallas import tpu as pltpu


def _round_up(x, m):
    return (x + m - 1) // m * m


# ----------------------------- kernels ---------------------------------------


def _fused_kernel(neigh_ref, w_ref, out_ref):
    # neigh_ref: (TILE_N, K*D_in)  bf16/f32 streamed from HBM
    # w_ref:     (K*D_in, D_out)   weight tiled K times, 1/K pre-folded for 'mean'
    # out_ref:   (TILE_N, D_out)
    # K-reduction is folded into the MXU contraction: the streamed tile goes
    # straight from the DMA buffer into the MXU (f32 accumulation), no VPU cast
    # and no cross-sublane reduce on the bandwidth-critical stream.
    out_ref[...] = jnp.dot(
        neigh_ref[...], w_ref[...], preferred_element_type=jnp.float32
    ).astype(out_ref.dtype)


def _two_stage_kernel(neigh_ref, w_ref, out_ref):
    # Fallback (large replicated weight / large D_out): sum over K, then matmul.
    # neigh_ref: (TILE_N, K, D_in); w_ref: (D_in, D_out) f32; out_ref: (TILE_N, D_out)
    aggr = jnp.sum(neigh_ref[...].astype(jnp.float32), axis=1)
    out_ref[...] = jnp.dot(
        aggr, w_ref[...], preferred_element_type=jnp.float32
    ).astype(out_ref.dtype)


# ----------------------------- wrapper ----------------------------------------


def _vmem_sizes():
    """Generation-aware (physical VMEM, working-set budget) in bytes."""
    try:
        cap = int(pltpu.get_tpu_info().vmem_capacity_bytes)
    except Exception:
        cap = 64 * 1024 * 1024  # conservative fallback (v7x per-TC size)
    # ~96 MiB budget on v5e/v6e (128 MiB physical), ~48 MiB on v7x (64 MiB).
    return cap, cap * 3 // 4


@functools.partial(
    jax.jit,
    static_argnames=("aggr_method", "tile_n", "fuse_k_into_matmul", "out_dtype"),
)
def neighbor_aggregator_forward(
    neighbor_feature,
    weight,
    bias=None,
    *,
    aggr_method="mean",
    tile_n=None,
    fuse_k_into_matmul=None,
    out_dtype=jnp.float32,
):
    """neighbor_feature: [N, K, D_in] (f32 or bf16); weight: [D_in, D_out].

    Returns [N, D_out] in `out_dtype`, matching NeighborAggregator.forward.
    """
    N, K, D_in = neighbor_feature.shape
    D_in_w, D_out = weight.shape
    assert D_in_w == D_in, "weight must be [D_in, D_out]"

    if aggr_method == "mean":
        scale = 1.0 / K
    elif aggr_method == "sum":
        scale = 1.0
    else:
        # TODO(synk): 'max' aggregation needs a masked-max kernel (ragged-boundary
        # garbage would corrupt a max); only 'mean'/'sum' are implemented here.
        raise ValueError(f"aggr_method {aggr_method!r} not supported by this kernel")

    neigh_dtype = neighbor_feature.dtype
    neigh_itemsize = jnp.dtype(neigh_dtype).itemsize
    # bf16 streams feed the MXU directly; everything else computes in f32.
    mm_dtype = jnp.bfloat16 if neigh_dtype == jnp.bfloat16 else jnp.float32
    mm_itemsize = jnp.dtype(mm_dtype).itemsize
    out_itemsize = jnp.dtype(out_dtype).itemsize

    vmem_cap, vmem_budget = _vmem_sizes()

    # Fused (K folded into the MXU) vs two-stage selection: the K-replicated
    # weight must stay small (it is double-buffered in VMEM) and D_out must stay
    # below the compute roofline of the K-times-larger matmul.
    rep_w_bytes = K * D_in * D_out * mm_itemsize
    if fuse_k_into_matmul is None:
        fuse_k_into_matmul = (rep_w_bytes <= 8 * 1024 * 1024) and (D_out <= 256)

    if fuse_k_into_matmul:
        KD = K * D_in
        neigh_in = neighbor_feature.reshape(N, KD)        # row-major reshape: free
        w_scaled = (weight.astype(jnp.float32) * scale).astype(mm_dtype)
        w_in = jnp.tile(w_scaled, (K, 1))                 # (K*D_in, D_out)
        kernel = _fused_kernel
        # TODO(synk): single-buffer this constant-index weight block with
        # pipeline_mode=pl.Buffered(1) once verified on the target jax version;
        # until then its 2x residency is accounted for in the budget.
        w_vmem = 2 * KD * D_out * mm_itemsize
        per_row = 2 * KD * neigh_itemsize + 2 * D_out * out_itemsize
        neigh_spec = lambda tn: pl.BlockSpec((tn, KD), lambda i: (i, 0))
        w_spec = pl.BlockSpec((KD, D_out), lambda i: (0, 0))
        flops = 2 * N * KD * D_out
    else:
        neigh_in = neighbor_feature
        w_in = weight.astype(jnp.float32) * scale
        kernel = _two_stage_kernel
        w_vmem = 2 * D_in * D_out * 4
        # 2 streamed buffers + in-kernel f32 upcast of the tile + 2 output buffers.
        per_row = (2 * K * D_in * neigh_itemsize + K * D_in * 4
                   + 2 * D_out * out_itemsize)
        neigh_spec = lambda tn: pl.BlockSpec((tn, K, D_in), lambda i: (i, 0, 0))
        w_spec = pl.BlockSpec((D_in, D_out), lambda i: (0, 0))
        flops = N * K * D_in + 2 * N * D_in * D_out

    # tile_n: as large as the VMEM budget allows, but never so large the grid
    # degenerates below ~4 steps (keeps both v7x TensorCores busy and the DMA
    # pipeline overlapped).  Multiples of 8 are all the layout needs.
    if tile_n is None:
        avail = max(vmem_budget - w_vmem, per_row * 8)
        tile_n = max(8, (avail // per_row) // 8 * 8)
        tile_n = min(tile_n, _round_up(pl.cdiv(N, 4), 8), 2048)
    else:
        tile_n = max(8, _round_up(int(tile_n), 8))
    tile_n = min(tile_n, _round_up(N, 8))

    grid = (pl.cdiv(N, tile_n),)

    vmem_needed = tile_n * per_row + w_vmem
    vmem_limit = int(min(max(vmem_needed + (4 << 20), 32 << 20),
                         vmem_cap * 13 // 16))

    cost = pl.CostEstimate(
        flops=int(flops),
        transcendentals=0,
        bytes_accessed=int(N * K * D_in * neigh_itemsize
                           + w_in.size * jnp.dtype(w_in.dtype).itemsize
                           + N * D_out * out_itemsize),
    )

    out = pl.pallas_call(
        kernel,
        out_shape=jax.ShapeDtypeStruct((N, D_out), out_dtype),
        grid_spec=pltpu.PrefetchScalarGridSpec(
            num_scalar_prefetch=0,
            grid=grid,
            in_specs=[neigh_spec(tile_n), w_spec],
            out_specs=pl.BlockSpec((tile_n, D_out), lambda i: (i, 0)),
        ),
        compiler_params=pltpu.CompilerParams(
            dimension_semantics=("parallel",),      # megacore sharding on v7x
            vmem_limit_bytes=vmem_limit,
        ),
        cost_estimate=cost,
    )(neigh_in, w_in)

    if bias is not None:
        out = out + bias.astype(out.dtype)          # fuses with the call under jit
    return out


def kaiming_uniform(key, fan_in, fan_out):
    # Demo-only parameter init (approximates torch.nn.init.kaiming_uniform_, a=0).
    bound = jnp.sqrt(2.0) * jnp.sqrt(3.0 / fan_in)
    return jax.random.uniform(key, (fan_in, fan_out), jnp.float32,
                              minval=-bound, maxval=bound)


if __name__ == "__main__":
    key = jax.random.PRNGKey(0)
    ks = jax.random.split(key, 8)

    # --- Check 1: aligned shapes, f32, 'mean', fused (K folded into MXU) path.
    N, K, D_in, D_out = 64, 8, 128, 128
    neigh = jax.random.normal(ks[0], (N, K, D_in), jnp.float32)
    w = kaiming_uniform(ks[1], D_in, D_out)
    out = jax.block_until_ready(neighbor_aggregator_forward(neigh, w))
    ref = jnp.dot(jnp.mean(neigh, axis=1), w, precision=lax.Precision.HIGHEST)
    assert out.shape == (N, D_out)
    assert jnp.allclose(out, ref, atol=5e-3, rtol=5e-3), \
        f"check1 max abs err {float(jnp.max(jnp.abs(out - ref)))}"

    # --- Check 2: unaligned shapes + ragged node boundary (cdiv grid), 'sum'.
    N2, K2, Di2, Do2 = 50, 5, 96, 40
    neigh2 = jax.random.normal(ks[2], (N2, K2, Di2), jnp.float32)
    w2 = kaiming_uniform(ks[3], Di2, Do2)
    out2 = jax.block_until_ready(
        neighbor_aggregator_forward(neigh2, w2, aggr_method="sum", tile_n=16))
    ref2 = jnp.dot(jnp.sum(neigh2, axis=1), w2, precision=lax.Precision.HIGHEST)
    assert out2.shape == (N2, Do2)
    assert jnp.allclose(out2, ref2, atol=5e-3, rtol=5e-3), \
        f"check2 max abs err {float(jnp.max(jnp.abs(out2 - ref2)))}"

    # --- Check 3: two-stage fallback kernel (sum-then-matmul) + bias.
    b3 = jax.random.normal(ks[4], (Do2,), jnp.float32) * 0.1
    out3 = jax.block_until_ready(
        neighbor_aggregator_forward(neigh2, w2, b3, aggr_method="mean",
                                    tile_n=16, fuse_k_into_matmul=False))
    ref3 = jnp.dot(jnp.mean(neigh2, axis=1), w2,
                   precision=lax.Precision.HIGHEST) + b3
    assert jnp.allclose(out3, ref3, atol=5e-3, rtol=5e-3), \
        f"check3 max abs err {float(jnp.max(jnp.abs(out3 - ref3)))}"

    # --- Check 4: bf16 neighbor stream fed directly to the MXU (f32 accumulate).
    N4, K4, Di4, Do4 = 40, 10, 64, 48
    neigh4 = jax.random.normal(ks[5], (N4, K4, Di4), jnp.float32).astype(jnp.bfloat16)
    w4 = kaiming_uniform(ks[6], Di4, Do4)
    out4 = jax.block_until_ready(neighbor_aggregator_forward(neigh4, w4))
    ref4 = jnp.dot(jnp.mean(neigh4.astype(jnp.float32), axis=1), w4,
                   precision=lax.Precision.HIGHEST)
    assert jnp.allclose(out4, ref4, atol=2e-2, rtol=2e-2), \
        f"check4 max abs err {float(jnp.max(jnp.abs(out4 - ref4)))}"

    print("KERNEL_OK")
</pallas_src>

<mosaic_0001>
module attributes {stable_mosaic.version = 11 : i64} {
  func.func @_fused_kernel(%arg0: i32, %arg1: memref<16x1024xf32, #tpu.memory_space<vmem>>, %arg2: memref<1024x128xf32, #tpu.memory_space<vmem>>, %arg3: memref<16x128xf32, #tpu.memory_space<vmem>>) attributes {dimension_semantics = [#tpu.dimension_semantics<parallel>], iteration_bounds = array<i64: 4>, scalar_prefetch = 0 : i64, scratch_operands = 0 : i64, tpu.core_type = #tpu.core_type<tc>, window_params = [{transform_indices = @transform_0, window_bounds = array<i64: 16, 1024>}, {pipeline_mode = #tpu.pipeline_mode<synchronous>, transform_indices = @transform_1, window_bounds = array<i64: 1024, 128>}, {transform_indices = @transform_2, window_bounds = array<i64: 16, 128>}]} {
    %c0 = arith.constant 0 : index
    %c0_0 = arith.constant 0 : index
    %0 = vector.load %arg1[%c0, %c0_0] : memref<16x1024xf32, #tpu.memory_space<vmem>>, vector<16x1024xf32>
    %c0_1 = arith.constant 0 : index
    %c0_2 = arith.constant 0 : index
    %1 = vector.load %arg2[%c0_1, %c0_2] : memref<1024x128xf32, #tpu.memory_space<vmem>>, vector<1024x128xf32>
    %cst = arith.constant dense<0.000000e+00> : vector<16x128xf32>
    %2 = tpu.matmul %0, %1, %cst {dimension_numbers = #tpu.dot_dimension_numbers<[1], [0], [0], [1], [0, 0, 1, 1], [], []>} : vector<16x1024xf32>, vector<1024x128xf32>, vector<16x128xf32> -> vector<16x128xf32>
    %c0_3 = arith.constant 0 : index
    %c0_4 = arith.constant 0 : index
    %3 = vector.load %arg3[%c0_3, %c0_4] : memref<16x128xf32, #tpu.memory_space<vmem>>, vector<16x128xf32>
    tpu.vector_store %arg3[%c0_3, %c0_4], %2 {strides = array<i32>} : memref<16x128xf32, #tpu.memory_space<vmem>>, vector<16x128xf32>,
    return
  }
  func.func @transform_0(%arg0: i32) -> (i32, i32) {
    %c0_i32 = arith.constant 0 : i32
    %c0_i32_0 = arith.constant 0 : i32
    return %arg0, %c0_i32 : i32, i32
  }
  func.func @transform_1(%arg0: i32) -> (i32, i32) {
    %c0_i32 = arith.constant 0 : i32
    %c0_i32_0 = arith.constant 0 : i32
    %c0_i32_1 = arith.constant 0 : i32
    return %c0_i32, %c0_i32_0 : i32, i32
  }
  func.func @transform_2(%arg0: i32) -> (i32, i32) {
    %c0_i32 = arith.constant 0 : i32
    %c0_i32_0 = arith.constant 0 : i32
    return %arg0, %c0_i32 : i32, i32
  }
}

</mosaic_0001>

<bundles_post_ra>
// kernel: neighbor_aggregator_forward.1
= control target key start
LH: loop header
LB: loop body
LE: loop exit
PB: predicated region body
PF: predicated region fallthrough
CT: control target
= control target key end

     0   :  { %7 = vsyncpa [#allocation3], 0  ;;  %s1605_s0 = inlined_call_operand.vmem [shape: f32[64,1024], index: 0, kind: input, shape index: {}]   ;;  %s1606_s1 = inlined_call_operand.vmem [shape: f32[1024,128], index: 1, kind: input, shape index: {}]   ;;  %s1607_s2 = inlined_call_operand.hbm [shape: f32[64,128], index: 2, kind: output, shape index: {}]  }
   0x1   :  { %9 = vsyncpa [#allocation3 + $0x1], 0  ;;  %s1088_s9 = smov 0   ;;  %s1090_s10 = smov 0  }
   0x2   :  { %s1092_s11 = smov 0   ;;  %s1094_s12 = smov 0  }
   0x3 LB: > { %s1109_s13 = sadd.s32 4294967295, %s1068_s12   ;;  %s670_s14 = sadd.s32 4294967294, %s1068_s12   ;;  %s1068_s12 = sphi %s1094_s12, %s1614_s12   ;;  %s1064_s11 = sphi %s1092_s11, %s1613_s11   ;;  %s1060_s10 = sphi %s1090_s10, %s1612_s10   ;;  %s1056_s9 = sphi %s1088_s9, %s1611_s9  }
   0x4   : > { %s1113_s15 = sadd.s32 1, %s1068_s12   ;;  %s69_s16 = sadd.s32 1, %s1064_s11 }
   0x5   : > { %s66_s17 = ssub.s32 %s1068_s12, %s1113_s15  ;;  %p79_p0 = scmp.ne.s32.totalorder %s1064_s11, %s1060_s10 }
   0x6   : > { %p67_p1 = scmp.eq.s32.totalorder %s66_s17, 0  ;;  %p80_p2 = scmp.eq.s32.totalorder %s1109_s13, 3 }
   0x7   : > { %p85_p3 = scmp.ne.s32.totalorder %s1060_s10, %s1056_s9  ;;  %p86_p4 = scmp.eq.s32.totalorder %s670_s14, 3 }
   0x8   : > { %s1124_s18 = scalar_select %p67_p1, %s1064_s11, %s69_s16  }
   0x9   : > { %p1126_p5 = por %p80_p2, %p79_p0  ;;  %p1130_p6 = por %p86_p4, %p85_p3 }
   0xa   : > { %p673_p7 = scmp.ge.s32.totalorder %s1068_s12, 1  ;;  %p117_p8 = scmp.lt.s32.totalorder %s1068_s12, 5 }
   0xc   : > { %p118_p9 = pnand %p673_p7, %p117_p8 }
   0xd   : > { %v180_v0 = vld [vmem:[%s1606_s1 + $0x80] sm:$0xff] (!%p118_p9)  ;;  %v181_v1 = vld [vmem:[%s1606_s1 + $0x88] sm:$0xff] (!%p118_p9)  ;;  %v182_v11 = vld [vmem:[%s1606_s1 + $0x90] sm:$0xff] (!%p118_p9)  ;;  %s675_s4 = sshll.u32 (!%p118_p9), %s1109_s13, 1  ;;  %s137_s5 = sand.u32 (!%p118_p9), 1, %s1060_s10  }
   0xe   : > { %121 = sbr.rel (%p118_p9) target bundleno = 319 (0x13f), region = 28  ;;  %v212_v2 = vld [vmem:[%s1606_s1 + $0x180] sm:$0xff] (!%p118_p9)  ;;  %v837_v3 = vpack.c.bf16 (!%p118_p9), %v181_v1, %v180_v0  ;;  %v213_v4 = vld [vmem:[%s1606_s1 + $0x188] sm:$0xff] (!%p118_p9)  ;;  %v183_v13 = vld [vmem:[%s1606_s1 + $0x98] sm:$0xff] (!%p118_p9)  ;;  %p1211_p10 = scmp.lt.s32.totalorder (!%p118_p9), %s675_s4, 7 }
   0xf   : > { %v164_v5 = vld [vmem:[%s1606_s1] sm:$0xff] (!%p118_p9)  ;;  %v165_v6 = vld [vmem:[%s1606_s1 + $0x8] sm:$0xff] (!%p118_p9)  ;;  %v869_v7 = vpack.c.bf16 (!%p118_p9), %v213_v4, %v212_v2  ;;  %v214_v14 = vld [vmem:[%s1606_s1 + $0x190] sm:$0xff] (!%p118_p9)  ;;  %v841_v16 = vpack.c.bf16 (!%p118_p9), %v183_v13, %v182_v11  ;;  %s684_s30 = sshll.u32 (!%p118_p9), %s1109_s13, 8  ;;  %s1564_s14 = scalar_lea.sflag (!%p118_p9), [#allocation3], %s137_s5 }
  0x10   : > { %v839_v8 = vpack.c.bf16 (!%p118_p9), %v165_v6, %v164_v5  ;;  %v196_v9 = vld [vmem:[%s1606_s1 + $0x100] sm:$0xff] (!%p118_p9)  ;;  %v197_v10 = vld [vmem:[%s1606_s1 + $0x108] sm:$0xff] (!%p118_p9)  ;;  %838 = vmatprep.subr.bf16.mxu0 (!%p118_p9), %v837_v3  ;;  %v215_v15 = vld [vmem:[%s1606_s1 + $0x198] sm:$0xff] (!%p118_p9)  ;;  %s1562_s8 = scalar_lea.hbm (!%p118_p9), %s1607_s2, %s684_s30  ;;  %s1070_s13 = smov (!%p118_p9), [#allocation2]  }
  0x11   : > { %v871_v12 = vpack.c.bf16 (!%p118_p9), %v197_v10, %v196_v9  ;;  %870 = vmatprep.subr.bf16.mxu1 (!%p118_p9), %v869_v7  ;;  %v873_v17 = vpack.c.bf16 (!%p118_p9), %v215_v15, %v214_v14  ;;  %v166_v18 = vld [vmem:[%s1606_s1 + $0x10] sm:$0xff] (!%p118_p9)  ;;  %v167_v19 = vld [vmem:[%s1606_s1 + $0x18] sm:$0xff] (!%p118_p9)  ;;  %v184_v23 = vld [vmem:[%s1606_s1 + $0xa0] sm:$0xff] (!%p118_p9)  ;;  %s1010_s21 = sshll.u32 (!%p118_p9), %s1070_s13, 4  ;;  %s1011_s21 = int_to_ptr.vmem [resolvable:$false] %s1010_s21 }
  0x12   : > { %840 = vmatpush3.bf16.msra.mxu0 (!%p118_p9), %v839_v8  ;;  %v198_v20 = vld [vmem:[%s1606_s1 + $0x110] sm:$0xff] (!%p118_p9)  ;;  %v843_v21 = vpack.c.bf16 (!%p118_p9), %v167_v19, %v166_v18  ;;  %v199_v22 = vld [vmem:[%s1606_s1 + $0x118] sm:$0xff] (!%p118_p9)  ;;  %v185_v24 = vld [vmem:[%s1606_s1 + $0xa8] sm:$0xff] (!%p118_p9)  ;;  %s1012_s22 = scalar_lea.vmem (!%p118_p9), %s1011_s21, 512 }
  0x13   : > { %872 = vmatpush3.bf16.msra.mxu1 (!%p118_p9), %v871_v12  ;;  %842 = vmatprep.subr.bf16.mxu0 (!%p118_p9), %v841_v16  ;;  %v875_v25 = vpack.c.bf16 (!%p118_p9), %v199_v22, %v198_v20  ;;  %v845_v26 = vpack.c.bf16 (!%p118_p9), %v185_v24, %v184_v23  ;;  %v216_v27 = vld [vmem:[%s1606_s1 + $0x1a0] sm:$0xff] (!%p118_p9)  ;;  %v217_v28 = vld [vmem:[%s1606_s1 + $0x1a8] sm:$0xff] (!%p118_p9)  ;;  %v186_v35 = vld [vmem:[%s1606_s1 + $0xb0] sm:$0xff] (!%p118_p9) }
  0x14   : > { %874 = vmatprep.subr.bf16.mxu1 (!%p118_p9), %v873_v17  ;;  %v168_v29 = vld [vmem:[%s1606_s1 + $0x20] sm:$0xff] (!%p118_p9)  ;;  %v877_v30 = vpack.c.bf16 (!%p118_p9), %v217_v28, %v216_v27  ;;  %v169_v31 = vld [vmem:[%s1606_s1 + $0x28] sm:$0xff] (!%p118_p9)  ;;  %v187_v36 = vld [vmem:[%s1606_s1 + $0xb8] sm:$0xff] (!%p118_p9) }
  0x15   : > { %v200_v32 = vld [vmem:[%s1606_s1 + $0x120] sm:$0xff]  ;;  %v201_v33 = vld [vmem:[%s1606_s1 + $0x128] sm:$0xff]  ;;  %v847_v34 = vpack.c.bf16 %v169_v31, %v168_v29  ;;  %v218_v37 = vld [vmem:[%s1606_s1 + $0x1b0] sm:$0xff]  ;;  %v849_v39 = vpack.c.bf16 %v187_v36, %v186_v35  ;;  %s1616_s4 = smov (!%p1211_p10, %s675_s4), 7 }
  0x16   : > { %844 = vmatpush3.bf16.msra.mxu0 %v843_v21  ;;  %v879_v38 = vpack.c.bf16 %v201_v33, %v200_v32  ;;  %v219_v40 = vld [vmem:[%s1606_s1 + $0x1b8] sm:$0xff]  ;;  %v170_v41 = vld [vmem:[%s1606_s1 + $0x30] sm:$0xff]  ;;  %v188_v46 = vld [vmem:[%s1606_s1 + $0xc0] sm:$0xff]  ;;  %s683_s17 = sshll.u32 %s1616_s4, 6 }
  0x17   : > { %876 = vmatpush3.bf16.msra.mxu1 %v875_v25  ;;  %846 = vmatprep.subr.bf16.mxu0 %v845_v26  ;;  %v171_v42 = vld [vmem:[%s1606_s1 + $0x38] sm:$0xff]  ;;  %v881_v43 = vpack.c.bf16 %v219_v40, %v218_v37  ;;  %v202_v44 = vld [vmem:[%s1606_s1 + $0x130] sm:$0xff]  ;;  %v189_v47 = vld [vmem:[%s1606_s1 + $0xc8] sm:$0xff]  ;;  %s1303_s7 = scalar_lea.vmem %s1605_s0, %s683_s17 }
  0x18   : > { %878 = vmatprep.subr.bf16.mxu1 %v877_v30  ;;  %v203_v45 = vld [vmem:[%s1606_s1 + $0x138] sm:$0xff]  ;;  %v220_v48 = vld [vmem:[%s1606_s1 + $0x1c0] sm:$0xff]  ;;  %v221_v49 = vld [vmem:[%s1606_s1 + $0x1c8] sm:$0xff]  ;;  %v851_v50 = vpack.c.bf16 %v171_v42, %v170_v41  ;;  %v853_v52 = vpack.c.bf16 %v189_v47, %v188_v46 }
  0x19   : > { %v883_v51 = vpack.c.bf16 %v203_v45, %v202_v44  ;;  %v172_v53 = vld [vmem:[%s1606_s1 + $0x40] sm:$0xff]  ;;  %v173_v54 = vld [vmem:[%s1606_s1 + $0x48] sm:$0xff]  ;;  %v885_v56 = vpack.c.bf16 %v221_v49, %v220_v48  ;;  %v190_v58 = vld [vmem:[%s1606_s1 + $0xd0] sm:$0xff] }
  0x1a   : > { %848 = vmatpush3.bf16.msra.mxu0 %v847_v34  ;;  %v204_v55 = vld [vmem:[%s1606_s1 + $0x140] sm:$0xff]  ;;  %v205_v57 = vld [vmem:[%s1606_s1 + $0x148] sm:$0xff]  ;;  %v191_v59 = vld [vmem:[%s1606_s1 + $0xd8] sm:$0xff]  ;;  %v855_v62 = vpack.c.bf16 %v173_v54, %v172_v53 }
  0x1b   : > { %880 = vmatpush3.bf16.msra.mxu1 %v879_v38  ;;  %850 = vmatprep.subr.bf16.mxu0 %v849_v39  ;;  %v222_v60 = vld [vmem:[%s1606_s1 + $0x1d0] sm:$0xff]  ;;  %v223_v61 = vld [vmem:[%s1606_s1 + $0x1d8] sm:$0xff]  ;;  %v887_v63 = vpack.c.bf16 %v205_v57, %v204_v55  ;;  %v857_v0 = vpack.c.bf16 %v191_v59, %v190_v58  ;;  %v192_v6 = vld [vmem:[%s1606_s1 + $0xe0] sm:$0xff] }
  0x1c   : > { %882 = vmatprep.subr.bf16.mxu1 %v881_v43  ;;  %v174_v1 = vld [vmem:[%s1606_s1 + $0x50] sm:$0xff]  ;;  %v175_v2 = vld [vmem:[%s1606_s1 + $0x58] sm:$0xff]  ;;  %v889_v4 = vpack.c.bf16 %v223_v61, %v222_v60  ;;  %v193_v7 = vld [vmem:[%s1606_s1 + $0xe8] sm:$0xff] }
  0x1d   : > { %v206_v3 = vld [vmem:[%s1606_s1 + $0x150] sm:$0xff]  ;;  %v207_v5 = vld [vmem:[%s1606_s1 + $0x158] sm:$0xff]  ;;  %v224_v8 = vld [vmem:[%s1606_s1 + $0x1e0] sm:$0xff]  ;;  %v859_v10 = vpack.c.bf16 %v175_v2, %v174_v1  ;;  %v861_v14 = vpack.c.bf16 %v193_v7, %v192_v6 }
  0x1e   : > { %852 = vmatpush3.bf16.msra.mxu0 %v851_v50  ;;  %v225_v9 = vld [vmem:[%s1606_s1 + $0x1e8] sm:$0xff]  ;;  %v176_v11 = vld [vmem:[%s1606_s1 + $0x60] sm:$0xff]  ;;  %v891_v13 = vpack.c.bf16 %v207_v5, %v206_v3  ;;  %v151_v17 = vld [vmem:[%s1303_s7 + $0x18] sm:$0xff] }
  0x1f   : > { %884 = vmatpush3.bf16.msra.mxu1 %v883_v51  ;;  %854 = vmatprep.subr.bf16.mxu0 %v853_v52  ;;  %v177_v12 = vld [vmem:[%s1606_s1 + $0x68] sm:$0xff]  ;;  %v208_v15 = vld [vmem:[%s1606_s1 + $0x160] sm:$0xff]  ;;  %v893_v18 = vpack.c.bf16 %v225_v9, %v224_v8  ;;  %v194_v20 = vld [vmem:[%s1606_s1 + $0xf0] sm:$0xff] }
  0x20   : > { %886 = vmatprep.subr.bf16.mxu1 %v885_v56  ;;  %v149_v16 = vld [vmem:[%s1303_s7 + $0x8] sm:$0xff]  ;;  %v195_v21 = vld [vmem:[%s1606_s1 + $0xf8] sm:$0xff]  ;;  %v226_v22 = vld [vmem:[%s1606_s1 + $0x1f0] sm:$0xff]  ;;  %431 = vmatprep.mubr.f32.mxu1 %v151_v17  ;;  %v863_v24 = vpack.c.bf16 %v177_v12, %v176_v11 }
  0x21   : > { %v209_v19 = vld [vmem:[%s1606_s1 + $0x168] sm:$0xff]  ;;  %356 = vmatprep.mubr.f32.mxu0 %v149_v16  ;;  %v227_v23 = vld [vmem:[%s1606_s1 + $0x1f8] sm:$0xff]  ;;  %v865_v26 = vpack.c.bf16 %v195_v21, %v194_v20  ;;  %v178_v27 = vld [vmem:[%s1606_s1 + $0x70] sm:$0xff] }
  0x22   : > { %856 = vmatpush3.bf16.msra.mxu0 %v855_v62  ;;  %v895_v25 = vpack.c.bf16 %v209_v19, %v208_v15  ;;  %v179_v28 = vld [vmem:[%s1606_s1 + $0x78] sm:$0xff]  ;;  %v210_v29 = vld [vmem:[%s1606_s1 + $0x170] sm:$0xff]  ;;  %v897_v30 = vpack.c.bf16 %v227_v23, %v226_v22  ;;  %v244_v32 = vld [vmem:[%s1606_s1 + $0x280] sm:$0xff] }
  0x23   : > { %888 = vmatpush3.bf16.msra.mxu1 %v887_v63  ;;  %858 = vmatprep.subr.bf16.mxu0 %v857_v0  ;;  %v211_v31 = vld [vmem:[%s1606_s1 + $0x178] sm:$0xff]  ;;  %v245_v33 = vld [vmem:[%s1606_s1 + $0x288] sm:$0xff]  ;;  %v276_v34 = vld [vmem:[%s1606_s1 + $0x380] sm:$0xff]  ;;  %v867_v36 = vpack.c.bf16 %v179_v28, %v178_v27 }
  0x24   : > { %890 = vmatprep.subr.bf16.mxu1 %v889_v4  ;;  %v277_v35 = vld [vmem:[%s1606_s1 + $0x388] sm:$0xff]  ;;  %v899_v37 = vpack.c.bf16 %v211_v31, %v210_v29  ;;  %v901_v38 = vpack.c.bf16 %v245_v33, %v244_v32  ;;  %v228_v39 = vld [vmem:[%s1606_s1 + $0x200] sm:$0xff]  ;;  %v246_v44 = vld [vmem:[%s1606_s1 + $0x290] sm:$0xff] }
  0x25   : > { %v229_v40 = vld [vmem:[%s1606_s1 + $0x208] sm:$0xff]  ;;  %v260_v41 = vld [vmem:[%s1606_s1 + $0x300] sm:$0xff]  ;;  %v933_v42 = vpack.c.bf16 %v277_v35, %v276_v34  ;;  %v247_v45 = vld [vmem:[%s1606_s1 + $0x298] sm:$0xff] }
  0x26   : > { %860 = vmatpush3.bf16.msra.mxu0 %v859_v10  ;;  %v261_v43 = vld [vmem:[%s1606_s1 + $0x308] sm:$0xff]  ;;  %v278_v46 = vld [vmem:[%s1606_s1 + $0x390] sm:$0xff]  ;;  %v279_v47 = vld [vmem:[%s1606_s1 + $0x398] sm:$0xff]  ;;  %v903_v50 = vpack.c.bf16 %v229_v40, %v228_v39  ;;  %v905_v52 = vpack.c.bf16 %v247_v45, %v246_v44 }
  0x27   : > { %892 = vmatpush3.bf16.msra.mxu1 %v891_v13  ;;  %862 = vmatprep.subr.bf16.mxu0 %v861_v14  ;;  %v148_v48 = vld [vmem:[%s1303_s7] sm:$0xff]  ;;  %v150_v49 = vld [vmem:[%s1303_s7 + $0x10] sm:$0xff]  ;;  %v935_v51 = vpack.c.bf16 %v261_v43, %v260_v41  ;;  %v231_v54 = vld [vmem:[%s1606_s1 + $0x218] sm:$0xff]  ;;  %v937_v56 = vpack.c.bf16 %v279_v47, %v278_v46 }
  0x28   : > { %894 = vmatprep.subr.bf16.mxu1 %v893_v18  ;;  %v230_v53 = vld [vmem:[%s1606_s1 + $0x210] sm:$0xff]  ;;  %v263_v57 = vld [vmem:[%s1606_s1 + $0x318] sm:$0xff]  ;;  %v248_v58 = vld [vmem:[%s1606_s1 + $0x2a0] sm:$0xff] }
  0x29   : > { %v262_v55 = vld [vmem:[%s1606_s1 + $0x310] sm:$0xff]  ;;  %v249_v59 = vld [vmem:[%s1606_s1 + $0x2a8] sm:$0xff]  ;;  %v280_v60 = vld [vmem:[%s1606_s1 + $0x3a0] sm:$0xff]  ;;  %v907_v62 = vpack.c.bf16 %v231_v54, %v230_v53 }
  0x2a   : > { %864 = vmatpush3.bf16.msra.mxu0 %v863_v24  ;;  %v281_v61 = vld [vmem:[%s1606_s1 + $0x3a8] sm:$0xff]  ;;  %v939_v63 = vpack.c.bf16 %v263_v57, %v262_v55  ;;  %v909_v0 = vpack.c.bf16 %v249_v59, %v248_v58  ;;  %v232_v1 = vld [vmem:[%s1606_s1 + $0x220] sm:$0xff]  ;;  %v250_v6 = vld [vmem:[%s1606_s1 + $0x2b0] sm:$0xff] }
  0x2b   : > { %896 = vmatpush3.bf16.msra.mxu1 %v895_v25  ;;  %866 = vmatprep.subr.bf16.mxu0 %v865_v26  ;;  %v233_v2 = vld [vmem:[%s1606_s1 + $0x228] sm:$0xff]  ;;  %v264_v3 = vld [vmem:[%s1606_s1 + $0x320] sm:$0xff]  ;;  %v941_v4 = vpack.c.bf16 %v281_v61, %v280_v60  ;;  %v251_v7 = vld [vmem:[%s1606_s1 + $0x2b8] sm:$0xff] }
  0x2c   : > { %898 = vmatprep.subr.bf16.mxu1 %v897_v30  ;;  %v265_v5 = vld [vmem:[%s1606_s1 + $0x328] sm:$0xff]  ;;  %v234_v8 = vld [vmem:[%s1606_s1 + $0x230] sm:$0xff]  ;;  %v283_v10 = vld [vmem:[%s1606_s1 + $0x3b8] sm:$0xff]  ;;  %v911_v11 = vpack.c.bf16 %v233_v2, %v232_v1  ;;  %v913_v16 = vpack.c.bf16 %v251_v7, %v250_v6 }
  0x2d   : > { %v282_v9 = vld [vmem:[%s1606_s1 + $0x3b0] sm:$0xff]  ;;  %v235_v12 = vld [vmem:[%s1606_s1 + $0x238] sm:$0xff]  ;;  %v157_v14 = vld [vmem:[%s1303_s7 + $0x48] sm:$0xff]  ;;  %v943_v15 = vpack.c.bf16 %v265_v5, %v264_v3 }
  0x2e   : > { %868 = vmatpush3.bf16.msra.mxu0 %v867_v36  ;;  %v266_v13 = vld [vmem:[%s1606_s1 + $0x330] sm:$0xff]  ;;  %v267_v17 = vld [vmem:[%s1606_s1 + $0x338] sm:$0xff]  ;;  %v252_v18 = vld [vmem:[%s1606_s1 + $0x2c0] sm:$0xff]  ;;  %v945_v20 = vpack.c.bf16 %v283_v10, %v282_v9  ;;  %v915_v26 = vpack.c.bf16 %v235_v12, %v234_v8 }
  0x2f   : > { %900 = vmatpush3.bf16.msra.mxu1 %v899_v37  ;;  %902 = vmatprep.subr.bf16.mxu0 %v901_v38  ;;  %v159_v19 = vld [vmem:[%s1303_s7 + $0x58] sm:$0xff]  ;;  %v253_v21 = vld [vmem:[%s1606_s1 + $0x2c8] sm:$0xff]  ;;  %v156_v22 = vld [vmem:[%s1303_s7 + $0x40] sm:$0xff]  ;;  %v947_v29 = vpack.c.bf16 %v267_v17, %v266_v13 }
  0x30   : > { %934 = vmatprep.subr.bf16.mxu1 %v933_v42  ;;  %v158_v23 = vld [vmem:[%s1303_s7 + $0x50] sm:$0xff]  ;;  %v284_v24 = vld [vmem:[%s1606_s1 + $0x3c0] sm:$0xff]  ;;  %v285_v25 = vld [vmem:[%s1606_s1 + $0x3c8] sm:$0xff]  ;;  %v917_v30 = vpack.c.bf16 %v253_v21, %v252_v18 }
  0x31   : > { %357 = vmatmul.mubr.f32.vlgmr.msra.gmra.mrb[0].mxu0 %v148_v48  ;;  %v236_v27 = vld [vmem:[%s1606_s1 + $0x240] sm:$0xff]  ;;  %v237_v28 = vld [vmem:[%s1606_s1 + $0x248] sm:$0xff]  ;;  %v949_v34 = vpack.c.bf16 %v285_v25, %v284_v24  ;;  %v254_v35 = vld [vmem:[%s1606_s1 + $0x2d0] sm:$0xff] }
  0x32   : > { %432 = vmatmul.mubr.f32.vlgmr.msra.gmra.mrb[0].mxu1 %v150_v49  ;;  %904 = vmatpush3.bf16.msra.mxu0 %v903_v50  ;;  %v268_v31 = vld [vmem:[%s1606_s1 + $0x340] sm:$0xff]  ;;  %v269_v32 = vld [vmem:[%s1606_s1 + $0x348] sm:$0xff]  ;;  %v255_v36 = vld [vmem:[%s1606_s1 + $0x2d8] sm:$0xff]  ;;  %v919_v40 = vpack.c.bf16 %v237_v28, %v236_v27 }
  0x33   : > { %936 = vmatpush3.bf16.msra.mxu1 %v935_v51  ;;  %906 = vmatprep.subr.bf16.mxu0 %v905_v52  ;;  %v153_v33 = vld [vmem:[%s1303_s7 + $0x28] sm:$0xff]  ;;  %v155_v37 = vld [vmem:[%s1303_s7 + $0x38] sm:$0xff]  ;;  %v286_v38 = vld [vmem:[%s1606_s1 + $0x3d0] sm:$0xff]  ;;  %v951_v41 = vpack.c.bf16 %v269_v32, %v268_v31  ;;  %v921_v42 = vpack.c.bf16 %v255_v36, %v254_v35 }
  0x34   : > { %938 = vmatprep.subr.bf16.mxu1 %v937_v56  ;;  %361 = vmatprep.mubr.f32.mxu0 %v157_v14  ;;  %v287_v39 = vld [vmem:[%s1606_s1 + $0x3d8] sm:$0xff]  ;;  %v238_v43 = vld [vmem:[%s1606_s1 + $0x250] sm:$0xff]  ;;  %v256_v48 = vld [vmem:[%s1606_s1 + $0x2e0] sm:$0xff] }
  0x35   : > { %436 = vmatprep.mubr.f32.mxu1 %v159_v19  ;;  %362 = vmatmul.mubr.f32.gmra.mrb[2].mxu0 %v156_v22  ;;  %v239_v44 = vld [vmem:[%s1606_s1 + $0x258] sm:$0xff]  ;;  %v270_v45 = vld [vmem:[%s1606_s1 + $0x350] sm:$0xff]  ;;  %v953_v46 = vpack.c.bf16 %v287_v39, %v286_v38  ;;  %v257_v49 = vld [vmem:[%s1606_s1 + $0x2e8] sm:$0xff] }
  0x36   : > { %908 = vmatpush3.bf16.msra.mxu0 %v907_v62  ;;  %437 = vmatmul.mubr.f32.gmra.mrb[2].mxu1 %v158_v23  ;;  %v271_v47 = vld [vmem:[%s1606_s1 + $0x358] sm:$0xff]  ;;  %v288_v50 = vld [vmem:[%s1606_s1 + $0x3e0] sm:$0xff]  ;;  %v289_v51 = vld [vmem:[%s1606_s1 + $0x3e8] sm:$0xff]  ;;  %v923_v52 = vpack.c.bf16 %v239_v44, %v238_v43  ;;  %v925_v54 = vpack.c.bf16 %v257_v49, %v256_v48 }
  0x37   : > { %940 = vmatpush3.bf16.msra.mxu1 %v939_v63  ;;  %910 = vmatprep.subr.bf16.mxu0 %v909_v0  ;;  %v955_v53 = vpack.c.bf16 %v271_v47, %v270_v45  ;;  %v240_v55 = vld [vmem:[%s1606_s1 + $0x260] sm:$0xff]  ;;  %v241_v56 = vld [vmem:[%s1606_s1 + $0x268] sm:$0xff]  ;;  %v957_v58 = vpack.c.bf16 %v289_v51, %v288_v50  ;;  %v258_v60 = vld [vmem:[%s1606_s1 + $0x2f0] sm:$0xff] }
  0x38   : > { %942 = vmatprep.subr.bf16.mxu1 %v941_v4  ;;  %506 = vmatprep.mubr.f32.mxu0 %v153_v33  ;;  %v272_v57 = vld [vmem:[%s1606_s1 + $0x360] sm:$0xff]  ;;  %v273_v59 = vld [vmem:[%s1606_s1 + $0x368] sm:$0xff]  ;;  %v259_v61 = vld [vmem:[%s1606_s1 + $0x2f8] sm:$0xff]  ;;  %v927_v0 = vpack.c.bf16 %v241_v56, %v240_v55 }
  0x39   : > { %581 = vmatprep.mubr.f32.mxu1 %v155_v37  ;;  %v290_v62 = vld [vmem:[%s1606_s1 + $0x3f0] sm:$0xff]  ;;  %v291_v63 = vld [vmem:[%s1606_s1 + $0x3f8] sm:$0xff]  ;;  %v959_v1 = vpack.c.bf16 %v273_v59, %v272_v57  ;;  %v929_v2 = vpack.c.bf16 %v259_v61, %v258_v60  ;;  %v152_v10 = vld [vmem:[%s1303_s7 + $0x20] sm:$0xff] }
  0x3a   : > { %912 = vmatpush3.bf16.msra.mxu0 %v911_v11  ;;  %v242_v3 = vld [vmem:[%s1606_s1 + $0x270] sm:$0xff]  ;;  %v243_v4 = vld [vmem:[%s1606_s1 + $0x278] sm:$0xff]  ;;  %v961_v5 = vpack.c.bf16 %v291_v63, %v290_v62  ;;  %v161_v12 = vld [vmem:[%s1303_s7 + $0x68] sm:$0xff] }
  0x3b   : > { %944 = vmatpush3.bf16.msra.mxu1 %v943_v15  ;;  %914 = vmatprep.subr.bf16.mxu0 %v913_v16  ;;  %v274_v6 = vld [vmem:[%s1606_s1 + $0x370] sm:$0xff]  ;;  %v275_v7 = vld [vmem:[%s1606_s1 + $0x378] sm:$0xff]  ;;  %v931_v8 = vpack.c.bf16 %v243_v4, %v242_v3  ;;  %v160_v14 = vld [vmem:[%s1303_s7 + $0x60] sm:$0xff] }
  0x3c   : > { %946 = vmatprep.subr.bf16.mxu1 %v945_v20  ;;  %v963_v9 = vpack.c.bf16 %v275_v7, %v274_v6  ;;  %v154_v11 = vld [vmem:[%s1303_s7 + $0x30] sm:$0xff]  ;;  %v163_v13 = vld [vmem:[%s1303_s7 + $0x78] sm:$0xff] }
  0x3d   : > { %v162_v15 = vld [vmem:[%s1303_s7 + $0x70] sm:$0xff]  ;;  %s674_s7 = sshll.u32 %s137_s5, 4 }
  0x3e   : > { %916 = vmatpush3.bf16.msra.mxu0 %v915_v26  ;;  %s139_s28 = scalar_lea.vmem [#allocation2], %s674_s7 }
  0x3f   : > { %948 = vmatpush3.bf16.msra.mxu1 %v947_v29  ;;  %918 = vmatprep.subr.bf16.mxu0 %v917_v30  ;;  %s608_s29 = sshll.u32 %s139_s28, 4  ;;  %s1557_s29 = int_to_ptr.vmem [resolvable:$true] %s608_s29 }
  0x40   : > { %950 = vmatprep.subr.bf16.mxu1 %v949_v34  ;;  %s1006_s16 = scalar_lea.vmem %s1557_s29, 256  ;;  %p1013_p0 = scmp.lt.s32.totalorder %s1557_s29, %s1011_s21 }
  0x41   : > { %p1007_p11 = scmp.ne.s32.totalorder %s1557_s29, %s1006_s16  ;;  %p1014_p1 = scmp.lt.s32.totalorder %s1012_s22, %s1006_s16 }
  0x42   : > { %920 = vmatpush3.bf16.msra.mxu0 %v919_v40 }
  0x43   : > { %952 = vmatpush3.bf16.msra.mxu1 %v951_v41  ;;  %922 = vmatprep.subr.bf16.mxu0 %v921_v42  ;;  %p1008_p12 = pnand %p1007_p11, %p1126_p5  ;;  %p1015_p2 = por %p1014_p1, %p1013_p0 }
  0x44   : > { %954 = vmatprep.subr.bf16.mxu1 %v953_v46 }
  0x45   : > { %p1009_p13 = pneg %p1008_p12 }
  0x46   : > { %924 = vmatpush3.bf16.msra.mxu0 %v923_v52 }
  0x47   : > { %956 = vmatpush3.bf16.msra.mxu1 %v955_v53  ;;  %926 = vmatprep.subr.bf16.mxu0 %v925_v54  ;;  %p1016_p3 = pnand %p1015_p2, %p1009_p13 }
  0x48   : > { %958 = vmatprep.subr.bf16.mxu1 %v957_v58 }
  0x4a   : > { %928 = vmatpush3.bf16.msra.mxu0 %v927_v0 }
  0x4b   : > { %960 = vmatpush3.bf16.msra.mxu1 %v959_v1  ;;  %930 = vmatprep.subr.bf16.mxu0 %v929_v2 }
  0x4c   : > { %962 = vmatprep.subr.bf16.mxu1 %v961_v5 }
  0x4e   : > { %932 = vmatpush3.bf16.msra.mxu0 %v931_v8 }
  0x4f   : > { %964 = vmatpush3.bf16.msra.mxu1 %v963_v9 }
  0x51   : > { %507 = vmatmul.mubr.f32.vlgmr.msra.gmra.mrb[4].mxu0 %v152_v10 }
  0x52   : > { %582 = vmatmul.mubr.f32.vlgmr.msra.gmra.mrb[4].mxu1 %v154_v11  ;;  %511 = vmatprep.mubr.f32.mxu0 %v161_v12 }
  0x53   : > { %586 = vmatprep.mubr.f32.mxu1 %v163_v13 }
  0x55   : > { %512 = vmatmul.mubr.f32.gmra.mrb[6].mxu0 %v160_v14 }
  0x56   : > { %587 = vmatmul.mubr.f32.gmra.mrb[6].mxu1 %v162_v15 }
 0x104   : > { %v717_v16 = vpop.f32.mrb[0].mxu0 }
 0x105   : > { %v755_v17 = vpop.f32.mrb[0].mxu1  ;;  %v718_v18 = vpop.f32.mrb[1].mxu0 }
 0x106   : > { %v719_v19 = vadd.f32 %v718_v18, %v717_v16  ;;  %v756_v20 = vpop.f32.mrb[1].mxu1 }
 0x107   : > { %v757_v21 = vadd.f32 %v756_v20, %v755_v17 }
 0x108   : > { %v720_v23 = vpop.f32.mrb[2].mxu0 }
 0x109   : > { %v434_v22 = vadd.f32 %v757_v21, %v719_v19  ;;  %v758_v24 = vpop.f32.mrb[2].mxu1  ;;  %v721_v25 = vpop.f32.mrb[3].mxu0 }
 0x10a   : > { %v722_v26 = vadd.f32 %v721_v25, %v720_v23  ;;  %v759_v27 = vpop.f32.mrb[3].mxu1 }
 0x10b   : > { %v760_v28 = vadd.f32 %v759_v27, %v758_v24 }
 0x10d   : > { %v439_v29 = vadd.f32 %v760_v28, %v722_v26 }
 0x124   : > { %v793_v30 = vpop.f32.mrb[4].mxu0 }
 0x125   : > { %v794_v31 = vpop.f32.mrb[5].mxu0  ;;  %v831_v32 = vpop.f32.mrb[4].mxu1 }
 0x126   : > { %v795_v33 = vadd.f32 %v794_v31, %v793_v30  ;;  %v832_v34 = vpop.f32.mrb[5].mxu1 }
 0x127   : > { %v833_v35 = vadd.f32 %v832_v34, %v831_v32 }
 0x128   : > { %v509_v36 = vadd.f32 %v795_v33, %v434_v22  ;;  %v796_v37 = vpop.f32.mrb[6].mxu0 }
 0x129   : > { %v797_v38 = vpop.f32.mrb[7].mxu0  ;;  %v834_v39 = vpop.f32.mrb[6].mxu1 }
 0x12a   : > { %v584_v40 = vadd.f32 %v833_v35, %v509_v36  ;;  %v798_v41 = vadd.f32 %v797_v38, %v796_v37  ;;  %v835_v42 = vpop.f32.mrb[7].mxu1 }
 0x12b   : > { %v836_v43 = vadd.f32 %v835_v42, %v834_v39 }
 0x12c   : > { %592 = vst [vmem:[%s139_s28] sm:$0xff] %v584_v40  ;;  %v514_v44 = vadd.f32 %v798_v41, %v439_v29 }
 0x12e   : > { %v589_v45 = vadd.f32 %v836_v43, %v514_v44 }
 0x130   : > { %593 = vst [vmem:[%s139_s28 + $0x8] sm:$0xff] %v589_v45 }
 0x131   : > { %1019 = shalt.err (!%p1016_p3)
}
 0x132   : > { %s1020_s23 = scalar_lea.hbm %s1562_s8, 256  ;;  %s1024_s17 = scalar_lea.hbm %s1607_s2, 1024 }
 0x133   : > { %p1021_p4 = scmp.ne.s32.totalorder %s1562_s8, %s1020_s23  ;;  %p1025_p9 = scmp.lt.u32.totalorder %s1562_s8, %s1607_s2 }
 0x134   : > { %p1026_p10 = scmp.lt.u32.totalorder %s1024_s17, %s1020_s23  ;;  %p1028_p12 = scmp.lt.u32.totalorder %s1020_s23, %s1562_s8 }
 0x135   : > { %p1022_p7 = pnand %p1021_p4, %p1126_p5 }
 0x136   : > { %p1027_p11 = por %p1026_p10, %p1025_p9 }
 0x137   : > { %p1023_p8 = pneg %p1022_p7 }
 0x138   : > { %p1029_p13 = por %p1028_p12, %p1027_p11 }
 0x13a   : > { %p1030_p0 = pnand %p1029_p13, %p1023_p8 }
 0x13c   : > { %1033 = shalt.err (!%p1030_p0)
}
 0x13d   : > { %s1071_s27 = smov 128   ;;  %s1072_s5 = smov 8  }
 0x13e   : > { %965 = dma.vmem_to_hbm [thread:$0]  (%p1126_p5), %s1557_s29, 256, %s1562_s8, %s1564_s14, %s1071_s27, %s1071_s27, %s1072_s5  }
 0x13f PF: > { %p971_p1 = scmp.ge.s32.totalorder %s1068_s12, 2  ;;  %s623_s7 = sand.u32 1, %s1056_s9  }
 0x140   : > { %s624_s28 = scalar_lea.sflag [#allocation3], %s623_s7 }
 0x141   : > { %p968_p2 = pnand %p971_p1, %p1130_p6 }
 0x143   : > { %1051 = dma.done.wait (!%p968_p2), %s624_s28, 256  }
 0x144   : > { %1053 = vsyncadd (!%p968_p2), %s624_s28, 4294967040  ;;  %p12_p3 = scmp.ge.s32.totalorder %s1113_s15, 6   ;;  %s1611_s9 = smov %s1060_s10 }
 0x145   : > { %s1612_s10 = smov %s1064_s11  ;;  %s1613_s11 = smov %s1124_s18 }
 0x146   : > { %s1614_s12 = smov %s1113_s15  ;;  %14 = sbr.rel (!%p12_p3) target bundleno = 3 (0x3), region = 63 }
 0x14d   :  { %629 = vsyncpa [#allocation3], 1 }
 0x14e   :  { %631 = vsyncpa [#allocation3 + $0x1], 1 }

</bundles_post_ra>
